<compile_context>
chip_gen: v7x
topology: tpu7x:2x2x1
jax: 0.10.0
libtpu: 0.0.40
codegen_flags: <defaults>
</compile_context>

<pallas_src>
import functools

import jax
import jax.numpy as jnp
from jax.experimental import pallas as pl
from jax.experimental.pallas import tpu as pltpu

BN_EPS = 1e-5
_VMEM_LIMIT_BYTES = 48 * 1024 * 1024   # safe on v7x (64 MiB physical per TC)


def _round_up(x, m):
    return (x + m - 1) // m * m


# -----------------------------------------------------------------------------
# Fused kernel: L x (Linear[bf16 MXU] -> folded BN -> ReLU), one VMEM block.
# Ref layout:
#   refs[0]            h        (N, K0)    bf16
#   refs[1 : 1+L]      W_l      (K_l, F_l) bf16   (biases dropped: BN cancels them)
#   refs[1+L : 1+3L]   gamma_l, beta_l (1, F_l) f32
#   refs[-1]           out      (N, F_{L-1}) f32
# -----------------------------------------------------------------------------
def apply_node_func_kernel(num_layers, inv_n, *refs):
    L = num_layers
    w_refs = refs[1:1 + L]
    bn_refs = refs[1 + L:1 + 3 * L]
    o_ref = refs[-1]

    x = refs[0][...]                                     # bf16 (MXU input)
    for l in range(L):
        # MXU matmul: bf16 x bf16 -> f32 accumulate.
        z = jnp.dot(x, w_refs[l][...], preferred_element_type=jnp.float32)

        # Folded one-pass BatchNorm (training-mode batch stats) + ReLU.
        # Both reductions issued back-to-back so the XLU pipelines them.
        s1 = jnp.sum(z, axis=0, keepdims=True)
        s2 = jnp.sum(z * z, axis=0, keepdims=True)
        mean = s1 * inv_n
        # NOTE: var = E[z^2] - mean^2 is single-pass; marginally less stable
        # than the two-pass form, but fine with f32 accumulation here.
        var = s2 * inv_n - mean * mean
        scale = jax.lax.rsqrt(var + BN_EPS) * bn_refs[2 * l][...]
        shift = bn_refs[2 * l + 1][...] - mean * scale
        y = jnp.maximum(z * scale + shift, 0.0)          # f32 epilogue (v5e-safe)

        if l + 1 < L:
            x = y.astype(jnp.bfloat16)                   # cast only at MXU input
        else:
            o_ref[...] = y                               # lane-dense f32 store


def apply_node_func(h, params):
    """One pallas_call for the whole ApplyNodeFunc forward."""
    linears = params["linears"]
    L = len(linears)
    n, in_feats = h.shape
    d_out = linears[-1][0].shape[1]

    # Zero-pad the first matmul's contraction dim to a lane multiple (128):
    # fills the MXU pass and makes h lane-dense; result is unchanged.
    k_pad = _round_up(in_feats, 128)
    w0 = linears[0][0]
    if k_pad != in_feats:
        h = jnp.pad(h, ((0, 0), (0, k_pad - in_feats)))
        w0 = jnp.pad(w0, ((0, k_pad - in_feats), (0, 0)))

    weights = [w0.astype(jnp.bfloat16)] + [
        w.astype(jnp.bfloat16) for (w, _b) in linears[1:]
    ]
    # Linear biases are intentionally dropped (the following BatchNorm's mean
    # subtraction cancels any per-feature constant exactly).
    bns = list(params["mlp_bns"]) + [(params["bn_gamma"], params["bn_beta"])]

    inputs = [h.astype(jnp.bfloat16)] + weights
    for (g, b) in bns:
        inputs += [g.astype(jnp.float32), b.astype(jnp.float32)]

    # ---- VMEM budget guard (single whole-array block). -----------------------
    dims = [w.shape[1] for w in weights]
    io_bytes = sum(int(a.size) * a.dtype.itemsize for a in inputs) + n * d_out * 4
    act_bytes = 2 * n * max([k_pad] + dims) * 4          # two live f32 activations
    est_vmem = io_bytes + act_bytes
    if est_vmem > _VMEM_LIMIT_BYTES - (4 << 20):
        raise ValueError(
            f"Batch too large for the single-block kernel (~{est_vmem} B VMEM); "
            "add a row-axis grid with two-phase BN statistics.")

    # Advisory cost estimate so XLA can schedule around this small call.
    flops = 0
    prev = k_pad
    for d in dims:
        flops += 2 * n * prev * d + 6 * n * d            # matmul + BN/ReLU epilogue
        prev = d
    cost = pl.CostEstimate(flops=flops, transcendentals=sum(dims),
                           bytes_accessed=io_bytes)

    vmem = pl.BlockSpec(memory_space=pltpu.MemorySpace.VMEM)
    kernel = functools.partial(apply_node_func_kernel, L, 1.0 / n)
    return pl.pallas_call(
        kernel,
        out_shape=jax.ShapeDtypeStruct((n, d_out), jnp.float32),
        in_specs=[vmem] * len(inputs),
        out_specs=vmem,
        compiler_params=pltpu.CompilerParams(vmem_limit_bytes=_VMEM_LIMIT_BYTES),
        cost_estimate=cost,
    )(*inputs)


# -----------------------------------------------------------------------------
# Pure-JAX reference (mirrors the PyTorch module, biases included) for checking.
# -----------------------------------------------------------------------------
def apply_node_func_ref(h, params):
    def bn_relu(x, g, b):
        mean = jnp.mean(x, axis=0, keepdims=True)
        var = jnp.mean((x - mean) ** 2, axis=0, keepdims=True)
        return jnp.maximum((x - mean) / jnp.sqrt(var + BN_EPS) * g + b, 0.0)

    L = len(params["linears"])
    x = h
    for l in range(L - 1):
        w, b = params["linears"][l]
        x = bn_relu(jnp.dot(x, w) + b, *params["mlp_bns"][l])
    w, b = params["linears"][-1]
    x = jnp.dot(x, w) + b
    return bn_relu(x, params["bn_gamma"], params["bn_beta"])


# -----------------------------------------------------------------------------
# Deterministic parameter construction.
# -----------------------------------------------------------------------------
def init_params(key, in_feats, hidden_dim, out_dim, num_mlp_layers):
    keys = jax.random.split(key, 4 * num_mlp_layers + 4)
    ki = 0

    def nrm(shape, scale):
        nonlocal ki
        k = keys[ki]
        ki += 1
        return (scale * jax.random.normal(k, shape)).astype(jnp.float32)

    dims = [in_feats] + [hidden_dim] * (num_mlp_layers - 1) + [out_dim]
    linears = []
    for l in range(num_mlp_layers):
        fin, fout = dims[l], dims[l + 1]
        linears.append((nrm((fin, fout), (2.0 / (fin + fout)) ** 0.5),
                        nrm((1, fout), 0.01)))
    mlp_bns = []
    for l in range(num_mlp_layers - 1):
        mlp_bns.append((1.0 + nrm((1, dims[l + 1]), 0.1),
                        nrm((1, dims[l + 1]), 0.1)))
    return {
        "linears": linears,
        "mlp_bns": mlp_bns,
        "bn_gamma": 1.0 + nrm((1, out_dim), 0.1),
        "bn_beta": nrm((1, out_dim), 0.1),
    }


if __name__ == "__main__":
    N = 256            # nodes in the batch (multiple of 8 sublanes)
    IN_FEATS = 64      # zero-padded to 128 inside the wrapper
    HIDDEN_DIM = 128   # lane-dense hidden width
    OUT_DIM = 128      # lane-dense output width (= bn num_features)
    NUM_MLP_LAYERS = 2

    root = jax.random.PRNGKey(0)
    k_feat, k_par = jax.random.split(root, 2)

    h = jax.random.normal(k_feat, (N, IN_FEATS), jnp.float32)
    params = init_params(k_par, IN_FEATS, HIDDEN_DIM, OUT_DIM, NUM_MLP_LAYERS)

    out = apply_node_func(h, params)
    jax.block_until_ready(out)

    ref = apply_node_func_ref(h, params)

    assert out.shape == (N, OUT_DIM)
    assert bool(jnp.all(jnp.isfinite(out)))
    assert bool(jnp.all(out >= 0.0))                       # ReLU output
    assert bool(jnp.allclose(out, ref, rtol=5e-2, atol=5e-2))
    print("KERNEL_OK")
</pallas_src>

<mosaic_0001>
module attributes {stable_mosaic.version = 11 : i64} {
  func.func @apply_node_func_kernel(%arg0: memref<256x128xbf16, #tpu.memory_space<vmem>>, %arg1: memref<128x128xbf16, #tpu.memory_space<vmem>>, %arg2: memref<128x128xbf16, #tpu.memory_space<vmem>>, %arg3: memref<1x128xf32, #tpu.memory_space<vmem>>, %arg4: memref<1x128xf32, #tpu.memory_space<vmem>>, %arg5: memref<1x128xf32, #tpu.memory_space<vmem>>, %arg6: memref<1x128xf32, #tpu.memory_space<vmem>>, %arg7: memref<256x128xf32, #tpu.memory_space<vmem>>) attributes {dimension_semantics = [], scalar_prefetch = 0 : i64, scratch_operands = 0 : i64, tpu.core_type = #tpu.core_type<tc>} {
    %c0 = arith.constant 0 : index
    %c0_0 = arith.constant 0 : index
    %0 = vector.load %arg0[%c0, %c0_0] : memref<256x128xbf16, #tpu.memory_space<vmem>>, vector<256x128xbf16>
    %c0_1 = arith.constant 0 : index
    %c0_2 = arith.constant 0 : index
    %1 = vector.load %arg1[%c0_1, %c0_2] : memref<128x128xbf16, #tpu.memory_space<vmem>>, vector<128x128xbf16>
    %cst = arith.constant dense<0.000000e+00> : vector<256x128xf32>
    %2 = tpu.matmul %0, %1, %cst {dimension_numbers = #tpu.dot_dimension_numbers<[1], [0], [0], [1], [0, 0, 1, 1], [], []>} : vector<256x128xbf16>, vector<128x128xbf16>, vector<256x128xf32> -> vector<256x128xf32>
    %cst_3 = arith.constant dense<0.000000e+00> : vector<128xf32>
    %3 = vector.multi_reduction <add>, %2, %cst_3 [0] : vector<256x128xf32> to vector<128xf32>
    %4 = vector.shape_cast %3 : vector<128xf32> to vector<1x128xf32>
    %5 = arith.mulf %2, %2 : vector<256x128xf32>
    %cst_4 = arith.constant dense<0.000000e+00> : vector<128xf32>
    %6 = vector.multi_reduction <add>, %5, %cst_4 [0] : vector<256x128xf32> to vector<128xf32>
    %7 = vector.shape_cast %6 : vector<128xf32> to vector<1x128xf32>
    %cst_5 = arith.constant 3.906250e-03 : f32
    %8 = vector.broadcast %cst_5 : f32 to vector<1x128xf32>
    %9 = arith.mulf %4, %8 : vector<1x128xf32>
    %cst_6 = arith.constant 3.906250e-03 : f32
    %10 = vector.broadcast %cst_6 : f32 to vector<1x128xf32>
    %11 = arith.mulf %7, %10 : vector<1x128xf32>
    %12 = arith.mulf %9, %9 : vector<1x128xf32>
    %13 = arith.subf %11, %12 : vector<1x128xf32>
    %cst_7 = arith.constant 9.99999974E-6 : f32
    %14 = vector.broadcast %cst_7 : f32 to vector<1x128xf32>
    %15 = arith.addf %13, %14 : vector<1x128xf32>
    %16 = math.rsqrt %15 : vector<1x128xf32>
    %c0_8 = arith.constant 0 : index
    %c0_9 = arith.constant 0 : index
    %17 = vector.load %arg3[%c0_8, %c0_9] : memref<1x128xf32, #tpu.memory_space<vmem>>, vector<1x128xf32>
    %18 = arith.mulf %16, %17 : vector<1x128xf32>
    %c0_10 = arith.constant 0 : index
    %c0_11 = arith.constant 0 : index
    %19 = vector.load %arg4[%c0_10, %c0_11] : memref<1x128xf32, #tpu.memory_space<vmem>>, vector<1x128xf32>
    %20 = arith.mulf %9, %18 : vector<1x128xf32>
    %21 = arith.subf %19, %20 : vector<1x128xf32>
    %22 = vector.broadcast %18 : vector<1x128xf32> to vector<256x128xf32>
    %23 = arith.mulf %2, %22 : vector<256x128xf32>
    %24 = vector.broadcast %21 : vector<1x128xf32> to vector<256x128xf32>
    %25 = arith.addf %23, %24 : vector<256x128xf32>
    %cst_12 = arith.constant 0.000000e+00 : f32
    %26 = vector.broadcast %cst_12 : f32 to vector<256x128xf32>
    %27 = arith.maximumf %25, %26 : vector<256x128xf32>
    %28 = arith.truncf %27 : vector<256x128xf32> to vector<256x128xbf16>
    %c0_13 = arith.constant 0 : index
    %c0_14 = arith.constant 0 : index
    %29 = vector.load %arg2[%c0_13, %c0_14] : memref<128x128xbf16, #tpu.memory_space<vmem>>, vector<128x128xbf16>
    %cst_15 = arith.constant dense<0.000000e+00> : vector<256x128xf32>
    %30 = tpu.matmul %28, %29, %cst_15 {dimension_numbers = #tpu.dot_dimension_numbers<[1], [0], [0], [1], [0, 0, 1, 1], [], []>} : vector<256x128xbf16>, vector<128x128xbf16>, vector<256x128xf32> -> vector<256x128xf32>
    %cst_16 = arith.constant dense<0.000000e+00> : vector<128xf32>
    %31 = vector.multi_reduction <add>, %30, %cst_16 [0] : vector<256x128xf32> to vector<128xf32>
    %32 = vector.shape_cast %31 : vector<128xf32> to vector<1x128xf32>
    %33 = arith.mulf %30, %30 : vector<256x128xf32>
    %cst_17 = arith.constant dense<0.000000e+00> : vector<128xf32>
    %34 = vector.multi_reduction <add>, %33, %cst_17 [0] : vector<256x128xf32> to vector<128xf32>
    %35 = vector.shape_cast %34 : vector<128xf32> to vector<1x128xf32>
    %cst_18 = arith.constant 3.906250e-03 : f32
    %36 = vector.broadcast %cst_18 : f32 to vector<1x128xf32>
    %37 = arith.mulf %32, %36 : vector<1x128xf32>
    %cst_19 = arith.constant 3.906250e-03 : f32
    %38 = vector.broadcast %cst_19 : f32 to vector<1x128xf32>
    %39 = arith.mulf %35, %38 : vector<1x128xf32>
    %40 = arith.mulf %37, %37 : vector<1x128xf32>
    %41 = arith.subf %39, %40 : vector<1x128xf32>
    %cst_20 = arith.constant 9.99999974E-6 : f32
    %42 = vector.broadcast %cst_20 : f32 to vector<1x128xf32>
    %43 = arith.addf %41, %42 : vector<1x128xf32>
    %44 = math.rsqrt %43 : vector<1x128xf32>
    %c0_21 = arith.constant 0 : index
    %c0_22 = arith.constant 0 : index
    %45 = vector.load %arg5[%c0_21, %c0_22] : memref<1x128xf32, #tpu.memory_space<vmem>>, vector<1x128xf32>
    %46 = arith.mulf %44, %45 : vector<1x128xf32>
    %c0_23 = arith.constant 0 : index
    %c0_24 = arith.constant 0 : index
    %47 = vector.load %arg6[%c0_23, %c0_24] : memref<1x128xf32, #tpu.memory_space<vmem>>, vector<1x128xf32>
    %48 = arith.mulf %37, %46 : vector<1x128xf32>
    %49 = arith.subf %47, %48 : vector<1x128xf32>
    %50 = vector.broadcast %46 : vector<1x128xf32> to vector<256x128xf32>
    %51 = arith.mulf %30, %50 : vector<256x128xf32>
    %52 = vector.broadcast %49 : vector<1x128xf32> to vector<256x128xf32>
    %53 = arith.addf %51, %52 : vector<256x128xf32>
    %cst_25 = arith.constant 0.000000e+00 : f32
    %54 = vector.broadcast %cst_25 : f32 to vector<256x128xf32>
    %55 = arith.maximumf %53, %54 : vector<256x128xf32>
    %c0_26 = arith.constant 0 : index
    %c0_27 = arith.constant 0 : index
    %56 = vector.load %arg7[%c0_26, %c0_27] : memref<256x128xf32, #tpu.memory_space<vmem>>, vector<256x128xf32>
    tpu.vector_store %arg7[%c0_26, %c0_27], %55 {strides = array<i32>} : memref<256x128xf32, #tpu.memory_space<vmem>>, vector<256x128xf32>,
    return
  }
}

</mosaic_0001>

<bundles_post_ra>
// kernel: tpu_custom_call.1
= control target key start
LH: loop header
LB: loop body
LE: loop exit
PB: predicated region body
PF: predicated region fallthrough
CT: control target
= control target key end

     0   :  { %12 = vsyncpa [#allocation3], 0  ;;  %s2023_s0 = inlined_call_operand.hbm [shape: bf16[256,128], index: 0, kind: input, shape index: {}]   ;;  %s2024_s1 = inlined_call_operand.hbm [shape: bf16[128,128], index: 1, kind: input, shape index: {}]   ;;  %s2025_s2 = inlined_call_operand.hbm [shape: bf16[128,128], index: 2, kind: input, shape index: {}]   ;;  %s2026_s3 = inlined_call_operand.vmem [shape: f32[1,128], index: 3, kind: input, shape index: {}]   ;;  %s2027_s4 = inlined_call_operand.vmem [shape: f32[1,128], index: 4, kind: input, shape index: {}]   ;;  %s2028_s5 = inlined_call_operand.vmem [shape: f32[1,128], index: 5, kind: input, shape index: {}]   ;;  %s2029_s6 = inlined_call_operand.vmem [shape: f32[1,128], index: 6, kind: input, shape index: {}]   ;;  %s2030_s7 = inlined_call_operand.hbm [shape: f32[256,128], index: 7, kind: output, shape index: {}]  }
   0x1   :  { %13 = vsyncpa [#allocation6], 0 }
   0x2   :  { %14 = vsyncpa [#allocation4], 0  ;;  %s1473_s24 = smov [#allocation5]   ;;  %s1474_s26 = smov [#allocation2]  }
   0x3   :  { %s32_s25 = sshll.u32 %s1473_s24, 4  ;;  %s20_s27 = sshll.u32 %s1474_s26, 4  ;;  %s33_s25 = int_to_ptr.vmem [resolvable:$true] %s32_s25  ;;  %s1521_s27 = int_to_ptr.vmem [resolvable:$true] %s20_s27 }
   0x4   :  { %s1379_s30 = scalar_lea.hbm %s2024_s1, 1024 }
   0x5   :  { %p1380_p0 = scmp.ne.s32.totalorder %s2024_s1, %s1379_s30  ;;  %p1383_p1 = scmp.lt.u32.totalorder %s1379_s30, %s2024_s1 }
   0x7   :  { %p1385_p2 = pnand %p1383_p1, %p1380_p0 }
   0x9   :  { %1388 = shalt.err (!%p1385_p2)
}
   0xa   :  { %s1389_s12 = scalar_lea.vmem %s33_s25, 1024  ;;  %p1394_p4 = scmp.lt.s32.totalorder %s33_s25, %s33_s25 }
   0xb   :  { %p1390_p3 = scmp.ne.s32.totalorder %s33_s25, %s1389_s12  ;;  %p1395_p5 = scmp.lt.s32.totalorder %s1389_s12, %s1389_s12 }
   0xd   :  { %p1396_p6 = por %p1395_p5, %p1394_p4 }
   0xf   :  { %p1397_p7 = pnand %p1396_p6, %p1390_p3 }
  0x11   :  { %1400 = shalt.err (!%p1397_p7)
}
  0x12   :  { %s1475_s13 = smov 64   ;;  %s1476_s14 = smov 4  }
  0x13   :  { %38 = dma.hbm_to_vmem [thread:$0]  %s2024_s1, 1024, %s33_s25, [#allocation6], %s1475_s13, %s1475_s13, %s1476_s14  }
  0x14   :  { %s1401_s19 = scalar_lea.hbm %s2023_s0, 2048 }
  0x15   :  { %p1402_p8 = scmp.ne.s32.totalorder %s2023_s0, %s1401_s19  ;;  %p1405_p9 = scmp.lt.u32.totalorder %s1401_s19, %s2023_s0 }
  0x17   :  { %p1407_p10 = pnand %p1405_p9, %p1402_p8 }
  0x19   :  { %1410 = shalt.err (!%p1407_p10)
}
  0x1a   :  { %s1411_s24 = scalar_lea.vmem %s1521_s27, 2048  ;;  %p1416_p12 = scmp.lt.s32.totalorder %s1521_s27, %s1521_s27 }
  0x1b   :  { %p1412_p11 = scmp.ne.s32.totalorder %s1521_s27, %s1411_s24  ;;  %p1417_p13 = scmp.lt.s32.totalorder %s1411_s24, %s1411_s24 }
  0x1d   :  { %p1418_p0 = por %p1417_p13, %p1416_p12 }
  0x1f   :  { %p1419_p1 = pnand %p1418_p0, %p1412_p11 }
  0x21   :  { %1422 = shalt.err (!%p1419_p1)
}
  0x22   :  { %26 = dma.hbm_to_vmem [thread:$0]  %s2023_s0, 2048, %s1521_s27, [#allocation3], %s1475_s13, %s1475_s13, %s1476_s14  }
  0x23   :  { %s1477_s26 = smov [#allocation7]   ;;  %s1423_s8 = scalar_lea.hbm %s2025_s2, 1024 }
  0x24   :  { %s44_s28 = sshll.u32 %s1477_s26, 4  ;;  %p1424_p2 = scmp.ne.s32.totalorder %s2025_s2, %s1423_s8  ;;  %s45_s28 = int_to_ptr.vmem [resolvable:$true] %s44_s28 }
  0x25   :  { %p1427_p3 = scmp.lt.u32.totalorder %s1423_s8, %s2025_s2 }
  0x27   :  { %p1429_p4 = pnand %p1427_p3, %p1424_p2 }
  0x29   :  { %1432 = shalt.err (!%p1429_p4)
}
  0x2a   :  { %s1433_s15 = scalar_lea.vmem %s45_s28, 1024  ;;  %p1438_p6 = scmp.lt.s32.totalorder %s45_s28, %s45_s28 }
  0x2b   :  { %p1434_p5 = scmp.ne.s32.totalorder %s45_s28, %s1433_s15  ;;  %p1439_p7 = scmp.lt.s32.totalorder %s1433_s15, %s1433_s15 }
  0x2d   :  { %p1440_p8 = por %p1439_p7, %p1438_p6 }
  0x2f   :  { %p1441_p9 = pnand %p1440_p8, %p1434_p5 }
  0x31   :  { %1444 = shalt.err (!%p1441_p9)
}
  0x32   :  { %50 = dma.hbm_to_vmem [thread:$0]  %s2025_s2, 1024, %s45_s28, [#allocation6], %s1475_s13, %s1475_s13, %s1476_s14  }
  0x33   :  { %1467 = dma.done.wait [#allocation3], 2048  }
  0x34   :  { %1468 = vsyncadd [#allocation3], 4294965248 }
  0x35   :  { %1469 = dma.done.wait [#allocation6], 2048  }
  0x36   :  { %1470 = vsyncadd [#allocation6], 4294965248  ;;  %v1343_v0 = vld [vmem:[#allocation5] sm:$0xff]   ;;  %v1344_v1 = vld [vmem:[#allocation5 + $0x8] sm:$0xff]  }
  0x37   :  { %1239 = vmatprep.subr.bf16.mxu0 %v1343_v0  ;;  %v1345_v2 = vld [vmem:[#allocation5 + $0x10] sm:$0xff]   ;;  %v1346_v3 = vld [vmem:[#allocation5 + $0x18] sm:$0xff]   ;;  %v1351_v4 = vld [vmem:[#allocation2] sm:$0xff]  }
  0x38   :  { %1240 = vmatpush3.bf16.msra.mxu0 %v1343_v0  ;;  %1255 = vmatprep.mubr.bf16.mxu0 %v1351_v4  ;;  %v1347_v5 = vld [vmem:[#allocation5 + $0x20] sm:$0xff]   ;;  %v1348_v6 = vld [vmem:[#allocation5 + $0x28] sm:$0xff]   ;;  %v1349_v7 = vld [vmem:[#allocation5 + $0x30] sm:$0xff]  }
  0x39   :  { %1241 = vmatprep.subr.bf16.mxu0 %v1344_v1  ;;  %v1350_v8 = vld [vmem:[#allocation5 + $0x38] sm:$0xff]   ;;  %v1352_v9 = vld [vmem:[#allocation2 + $0x8] sm:$0xff]   ;;  %v1353_v10 = vld [vmem:[#allocation2 + $0x10] sm:$0xff]  }
  0x3a   :  { %v1354_v11 = vld [vmem:[#allocation2 + $0x18] sm:$0xff]   ;;  %v1355_v12 = vld [vmem:[#allocation2 + $0x20] sm:$0xff]   ;;  %v1356_v13 = vld [vmem:[#allocation2 + $0x28] sm:$0xff]  }
  0x3b   :  { %v1357_v14 = vld [vmem:[#allocation2 + $0x30] sm:$0xff]   ;;  %v1358_v15 = vld [vmem:[#allocation2 + $0x38] sm:$0xff]   ;;  %v1359_v16 = vld [vmem:[#allocation2 + $0x40] sm:$0xff]  }
  0x3c   :  { %1242 = vmatpush3.bf16.msra.mxu0 %v1344_v1  ;;  %v1360_v17 = vld [vmem:[#allocation2 + $0x48] sm:$0xff]   ;;  %v1361_v18 = vld [vmem:[#allocation2 + $0x50] sm:$0xff]   ;;  %v1362_v19 = vld [vmem:[#allocation2 + $0x58] sm:$0xff]  }
  0x3d   :  { %1243 = vmatprep.subr.bf16.mxu0 %v1345_v2  ;;  %v1363_v20 = vld [vmem:[#allocation2 + $0x60] sm:$0xff]   ;;  %v1364_v21 = vld [vmem:[#allocation2 + $0x68] sm:$0xff]   ;;  %v1365_v22 = vld [vmem:[#allocation2 + $0x70] sm:$0xff]  }
  0x3e   :  { %v1366_v23 = vld [vmem:[#allocation2 + $0x78] sm:$0xff]   ;;  %v1367_v24 = vld [vmem:[#allocation7] sm:$0xff]   ;;  %v1368_v25 = vld [vmem:[#allocation7 + $0x8] sm:$0xff]  }
  0x3f   :  { %1287 = vmatprep.subr.bf16.mxu1 %v1367_v24  ;;  %v1369_v26 = vld [vmem:[#allocation7 + $0x10] sm:$0xff]   ;;  %v1370_v27 = vld [vmem:[#allocation7 + $0x18] sm:$0xff]   ;;  %v1371_v28 = vld [vmem:[#allocation7 + $0x20] sm:$0xff]  }
  0x40   :  { %1244 = vmatpush3.bf16.msra.mxu0 %v1345_v2  ;;  %1288 = vmatpush3.bf16.msra.mxu1 %v1367_v24  ;;  %v1372_v29 = vld [vmem:[#allocation7 + $0x28] sm:$0xff]   ;;  %v1373_v30 = vld [vmem:[#allocation7 + $0x30] sm:$0xff]   ;;  %v1374_v31 = vld [vmem:[#allocation7 + $0x38] sm:$0xff]  }
  0x41   :  { %1245 = vmatprep.subr.bf16.mxu0 %v1346_v3  ;;  %1289 = vmatprep.subr.bf16.mxu1 %v1368_v25 }
  0x44   :  { %1246 = vmatpush3.bf16.msra.mxu0 %v1346_v3  ;;  %1290 = vmatpush3.bf16.msra.mxu1 %v1368_v25 }
  0x45   :  { %1247 = vmatprep.subr.bf16.mxu0 %v1347_v5  ;;  %1291 = vmatprep.subr.bf16.mxu1 %v1369_v26 }
  0x48   :  { %1248 = vmatpush3.bf16.msra.mxu0 %v1347_v5  ;;  %1292 = vmatpush3.bf16.msra.mxu1 %v1369_v26 }
  0x49   :  { %1249 = vmatprep.subr.bf16.mxu0 %v1348_v6  ;;  %1293 = vmatprep.subr.bf16.mxu1 %v1370_v27 }
  0x4c   :  { %1250 = vmatpush3.bf16.msra.mxu0 %v1348_v6  ;;  %1294 = vmatpush3.bf16.msra.mxu1 %v1370_v27 }
  0x4d   :  { %1251 = vmatprep.subr.bf16.mxu0 %v1349_v7  ;;  %1295 = vmatprep.subr.bf16.mxu1 %v1371_v28 }
  0x50   :  { %1252 = vmatpush3.bf16.msra.mxu0 %v1349_v7  ;;  %1296 = vmatpush3.bf16.msra.mxu1 %v1371_v28 }
  0x51   :  { %1253 = vmatprep.subr.bf16.mxu0 %v1350_v8  ;;  %1297 = vmatprep.subr.bf16.mxu1 %v1372_v29 }
  0x54   :  { %1254 = vmatpush3.bf16.msra.mxu0 %v1350_v8  ;;  %1298 = vmatpush3.bf16.msra.mxu1 %v1372_v29 }
  0x55   :  { %1299 = vmatprep.subr.bf16.mxu1 %v1373_v30 }
  0x57   :  { %1256 = vmatmul.mubr.bf16.vlgmr.msra.gmra.mrb[0].mxu0 %v1352_v9 }
  0x58   :  { %1259 = vmatprep.mubr.bf16.mxu0 %v1353_v10  ;;  %1300 = vmatpush3.bf16.msra.mxu1 %v1373_v30 }
  0x59   :  { %1301 = vmatprep.subr.bf16.mxu1 %v1374_v31 }
  0x5c   :  { %1302 = vmatpush3.bf16.msra.mxu1 %v1374_v31 }
  0x5f   :  { %1260 = vmatmul.mubr.bf16.gmra.mrb[4].mxu0 %v1354_v11 }
  0x60   :  { %1263 = vmatprep.mubr.bf16.mxu0 %v1355_v12 }
  0x67   :  { %1264 = vmatmul.mubr.bf16.gmra.mrb[8].mxu0 %v1356_v13 }
  0x68   :  { %1267 = vmatprep.mubr.bf16.mxu0 %v1357_v14 }
  0x6f   :  { %1268 = vmatmul.mubr.bf16.gmra.mrb[12].mxu0 %v1358_v15 }
  0x70   :  { %1271 = vmatprep.mubr.bf16.mxu0 %v1359_v16 }
  0x77   :  { %1272 = vmatmul.mubr.bf16.gmra.mrb[16].mxu0 %v1360_v17 }
  0x78   :  { %1275 = vmatprep.mubr.bf16.mxu0 %v1361_v18 }
  0x7f   :  { %1276 = vmatmul.mubr.bf16.gmra.mrb[20].mxu0 %v1362_v19 }
  0x80   :  { %1279 = vmatprep.mubr.bf16.mxu0 %v1363_v20 }
  0x87   :  { %1280 = vmatmul.mubr.bf16.gmra.mrb[24].mxu0 %v1364_v21 }
  0x88   :  { %1283 = vmatprep.mubr.bf16.mxu0 %v1365_v22 }
  0x8f   :  { %1284 = vmatmul.mubr.bf16.gmra.mrb[28].mxu0 %v1366_v23 }
 0x12a   :  { %v1573_v32 = vpop.f32.mrb[0].mxu0 }
 0x12b   :  { %v1575_v33 = vpop.f32.mrb[1].mxu0  ;;  %v461_v39 = vmul.f32 %v1573_v32, %v1573_v32 }
 0x12c   :  { %v1577_v34 = vpop.f32.mrb[2].mxu0  ;;  %v459_v36 = vmul.f32 %v1575_v33, %v1575_v33 }
 0x12d   :  { %v1579_v35 = vpop.f32.mrb[3].mxu0  ;;  %v462_v42 = vmul.f32 %v1577_v34, %v1577_v34 }
 0x12e   :  { %v422_v37 = vadd.f32 %v1579_v35, %v1575_v33  ;;  %v460_v38 = vmul.f32 %v1579_v35, %v1579_v35 }
 0x130   :  { %v423_v40 = vadd.f32 %v1573_v32, %v422_v37  ;;  %v491_v41 = vadd.f32 %v460_v38, %v459_v36 }
 0x132   :  { %v492_v43 = vadd.f32 %v491_v41, %v461_v39  ;;  %v1592_v44 = vpop.f32.mrb[4].mxu0  ;;  %v424_v45 = vadd.f32 %v1577_v34, %v423_v40 }
 0x133   :  { %v1595_v46 = vpop.f32.mrb[5].mxu0  ;;  %v465_v55 = vmul.f32 %v1592_v44, %v1592_v44 }
 0x134   :  { %v425_v47 = vadd.f32 %v424_v45, %v1595_v46  ;;  %v463_v48 = vmul.f32 %v1595_v46, %v1595_v46  ;;  %v493_v49 = vadd.f32 %v492_v43, %v462_v42  ;;  %v1600_v50 = vpop.f32.mrb[6].mxu0 }
 0x135   :  { %v1602_v51 = vpop.f32.mrb[7].mxu0  ;;  %v466_v58 = vmul.f32 %v1600_v50, %v1600_v50 }
 0x136   :  { %v494_v52 = vadd.f32 %v493_v49, %v463_v48  ;;  %v426_v53 = vadd.f32 %v425_v47, %v1602_v51  ;;  %v464_v54 = vmul.f32 %v1602_v51, %v1602_v51 }
 0x138   :  { %v427_v56 = vadd.f32 %v1592_v44, %v426_v53  ;;  %v495_v57 = vadd.f32 %v494_v52, %v464_v54 }
 0x13a   :  { %v496_v59 = vadd.f32 %v495_v57, %v465_v55  ;;  %v1612_v60 = vpop.f32.mrb[8].mxu0  ;;  %v428_v61 = vadd.f32 %v1600_v50, %v427_v56 }
 0x13b   :  { %v1615_v62 = vpop.f32.mrb[9].mxu0  ;;  %v469_v7 = vmul.f32 %v1612_v60, %v1612_v60 }
 0x13c   :  { %v429_v63 = vadd.f32 %v428_v61, %v1615_v62  ;;  %v467_v0 = vmul.f32 %v1615_v62, %v1615_v62  ;;  %v497_v1 = vadd.f32 %v496_v59, %v466_v58  ;;  %v1620_v2 = vpop.f32.mrb[10].mxu0 }
 0x13d   :  { %v1622_v3 = vpop.f32.mrb[11].mxu0  ;;  %v470_v10 = vmul.f32 %v1620_v2, %v1620_v2 }
 0x13e   :  { %v498_v4 = vadd.f32 %v497_v1, %v467_v0  ;;  %v430_v5 = vadd.f32 %v429_v63, %v1622_v3  ;;  %v468_v6 = vmul.f32 %v1622_v3, %v1622_v3 }
 0x140   :  { %v431_v8 = vadd.f32 %v1612_v60, %v430_v5  ;;  %v499_v9 = vadd.f32 %v498_v4, %v468_v6 }
 0x142   :  { %v500_v11 = vadd.f32 %v499_v9, %v469_v7  ;;  %v1632_v12 = vpop.f32.mrb[12].mxu0  ;;  %v432_v13 = vadd.f32 %v1620_v2, %v431_v8 }
 0x143   :  { %v1635_v14 = vpop.f32.mrb[13].mxu0  ;;  %v473_v23 = vmul.f32 %v1632_v12, %v1632_v12 }
 0x144   :  { %v433_v15 = vadd.f32 %v432_v13, %v1635_v14  ;;  %v471_v16 = vmul.f32 %v1635_v14, %v1635_v14  ;;  %v501_v17 = vadd.f32 %v500_v11, %v470_v10  ;;  %v1640_v18 = vpop.f32.mrb[14].mxu0 }
 0x145   :  { %v1642_v19 = vpop.f32.mrb[15].mxu0  ;;  %v474_v26 = vmul.f32 %v1640_v18, %v1640_v18 }
 0x146   :  { %v502_v20 = vadd.f32 %v501_v17, %v471_v16  ;;  %v434_v21 = vadd.f32 %v433_v15, %v1642_v19  ;;  %v472_v22 = vmul.f32 %v1642_v19, %v1642_v19 }
 0x148   :  { %v435_v24 = vadd.f32 %v1632_v12, %v434_v21  ;;  %v503_v25 = vadd.f32 %v502_v20, %v472_v22 }
 0x14a   :  { %v504_v27 = vadd.f32 %v503_v25, %v473_v23  ;;  %v1652_v28 = vpop.f32.mrb[16].mxu0  ;;  %v436_v29 = vadd.f32 %v1640_v18, %v435_v24 }
 0x14b   :  { %v1655_v30 = vpop.f32.mrb[17].mxu0  ;;  %v477_v43 = vmul.f32 %v1652_v28, %v1652_v28 }
 0x14c   :  { %v437_v31 = vadd.f32 %v436_v29, %v1655_v30  ;;  %v475_v36 = vmul.f32 %v1655_v30, %v1655_v30  ;;  %v505_v37 = vadd.f32 %v504_v27, %v474_v26  ;;  %v1660_v38 = vpop.f32.mrb[18].mxu0 }
 0x14d   :  { %v1662_v39 = vpop.f32.mrb[19].mxu0  ;;  %v478_v48 = vmul.f32 %v1660_v38, %v1660_v38 }
 0x14e   :  { %v506_v40 = vadd.f32 %v505_v37, %v475_v36  ;;  %v438_v41 = vadd.f32 %v437_v31, %v1662_v39  ;;  %v476_v42 = vmul.f32 %v1662_v39, %v1662_v39 }
 0x150   :  { %v439_v45 = vadd.f32 %v1652_v28, %v438_v41  ;;  %v507_v47 = vadd.f32 %v506_v40, %v476_v42 }
 0x152   :  { %v508_v49 = vadd.f32 %v507_v47, %v477_v43  ;;  %v1672_v52 = vpop.f32.mrb[20].mxu0  ;;  %v440_v53 = vadd.f32 %v1660_v38, %v439_v45 }
 0x153   :  { %v1675_v54 = vpop.f32.mrb[21].mxu0  ;;  %v481_v1 = vmul.f32 %v1672_v52, %v1672_v52 }
 0x154   :  { %v441_v55 = vadd.f32 %v440_v53, %v1675_v54  ;;  %v479_v56 = vmul.f32 %v1675_v54, %v1675_v54  ;;  %v509_v57 = vadd.f32 %v508_v49, %v478_v48  ;;  %v1680_v58 = vpop.f32.mrb[22].mxu0 }
 0x155   :  { %v1682_v59 = vpop.f32.mrb[23].mxu0  ;;  %v482_v6 = vmul.f32 %v1680_v58, %v1680_v58 }
 0x156   :  { %v510_v61 = vadd.f32 %v509_v57, %v479_v56  ;;  %v442_v63 = vadd.f32 %v441_v55, %v1682_v59  ;;  %v480_v0 = vmul.f32 %v1682_v59, %v1682_v59 }
 0x158   :  { %v443_v4 = vadd.f32 %v1672_v52, %v442_v63  ;;  %v511_v5 = vadd.f32 %v510_v61, %v480_v0 }
 0x15a   :  { %v512_v7 = vadd.f32 %v511_v5, %v481_v1  ;;  %v1692_v8 = vpop.f32.mrb[24].mxu0  ;;  %v444_v9 = vadd.f32 %v1680_v58, %v443_v4 }
 0x15b   :  { %v1695_v10 = vpop.f32.mrb[25].mxu0  ;;  %v485_v23 = vmul.f32 %v1692_v8, %v1692_v8 }
 0x15c   :  { %v445_v11 = vadd.f32 %v444_v9, %v1695_v10  ;;  %v483_v13 = vmul.f32 %v1695_v10, %v1695_v10  ;;  %v513_v15 = vadd.f32 %v512_v7, %v482_v6  ;;  %v1700_v16 = vpop.f32.mrb[26].mxu0 }
 0x15d   :  { %v1702_v17 = vpop.f32.mrb[27].mxu0  ;;  %v486_v26 = vmul.f32 %v1700_v16, %v1700_v16 }
 0x15e   :  { %v514_v20 = vadd.f32 %v513_v15, %v483_v13  ;;  %v446_v21 = vadd.f32 %v445_v11, %v1702_v17  ;;  %v484_v22 = vmul.f32 %v1702_v17, %v1702_v17 }
 0x160   :  { %v447_v24 = vadd.f32 %v1692_v8, %v446_v21  ;;  %v515_v25 = vadd.f32 %v514_v20, %v484_v22 }
 0x162   :  { %v516_v27 = vadd.f32 %v515_v25, %v485_v23  ;;  %v1712_v29 = vpop.f32.mrb[28].mxu0  ;;  %v448_v31 = vadd.f32 %v1700_v16, %v447_v24 }
 0x163   :  { %v1715_v36 = vpop.f32.mrb[29].mxu0  ;;  %v489_v49 = vmul.f32 %v1712_v29, %v1712_v29 }
 0x164   :  { %v449_v37 = vadd.f32 %v448_v31, %v1715_v36  ;;  %v487_v40 = vmul.f32 %v1715_v36, %v1715_v36  ;;  %v517_v41 = vadd.f32 %v516_v27, %v486_v26  ;;  %v1720_v42 = vpop.f32.mrb[30].mxu0  ;;  %v539_v27 = vlaneseq }
 0x165   :  { %v410_v43 = vpop.f32.mrb[31].mxu0  ;;  %v490_v56 = vmul.f32 %v1720_v42, %v1720_v42 }
 0x166   :  { %v518_v45 = vadd.f32 %v517_v41, %v487_v40  ;;  %v450_v47 = vadd.f32 %v449_v37, %v410_v43  ;;  %v488_v48 = vmul.f32 %v410_v43, %v410_v43  ;;  %v540_v31 = vshrl.u32 %v539_v27, 7  ;;  %v534_v37 = vld [vmem:[%s2026_s3] sm:$0x1] }
 0x168   :  { %v451_v53 = vadd.f32 %v1712_v29, %v450_v47  ;;  %v519_v55 = vadd.f32 %v518_v45, %v488_v48  ;;  %v1731_v40 = vsub.s32 0, %v540_v31  ;;  %v536_v47 = vld [vmem:[%s2027_s4] sm:$0x1] }
 0x16a   :  { %v452_v57 = vadd.f32 %v1720_v42, %v451_v53  ;;  %v520_v61 = vadd.f32 %v519_v55, %v489_v49 }
 0x16c   :  { %v453_v63 = vrot.slane %v452_v57, 4  ;;  %v521_v0 = vadd.f32 %v520_v61, %v490_v56 }
 0x16e   :  { %v454_v1 = vadd.f32 %v453_v63, %v452_v57  ;;  %v522_v4 = vrot.slane %v521_v0, 4 }
 0x170   :  { %v455_v5 = vrot.slane %v454_v1, 2  ;;  %v523_v6 = vadd.f32 %v522_v4, %v521_v0 }
 0x172   :  { %v456_v7 = vadd.f32 %v455_v5, %v454_v1  ;;  %v524_v9 = vrot.slane %v523_v6, 2 }
 0x174   :  { %v457_v11 = vrot.slane %v456_v7, 1  ;;  %v525_v13 = vadd.f32 %v524_v9, %v523_v6 }
 0x176   :  { %v458_v15 = vadd.f32 %v457_v11, %v456_v7  ;;  %v526_v20 = vrot.slane %v525_v13, 1 }
 0x178   :  { %v527_v21 = vadd.f32 %v526_v20, %v525_v13  ;;  %v528_v22 = vmul.f32 0.00390625, %v458_v15 }
 0x17a   :  { %v529_v23 = vmul.f32 0.00390625, %v527_v21  ;;  %v530_v24 = vmul.f32 %v528_v22, %v528_v22 }
 0x17c   :  { %v531_v25 = vsub.f32 %v529_v23, %v530_v24 }
 0x17e   :  { %v532_v26 = vadd.f32 1e-05, %v531_v25 }
 0x180   :  { %1375 = vrsqrt.f32 %v532_v26 }
 0x18a   :  { %v1376_v41 = vpop.eup %1375 }
 0x18b   :  { %v535_v45 = vmul.f32 %v1376_v41, %v534_v37 }
 0x18d   :  { %v537_v48 = vmul.f32 %v535_v45, %v528_v22  ;;  %v542_v49 = vrot.slane %v535_v45, %v1731_v40 }
 0x18f   :  { %v538_v53 = vsub.f32 %v536_v47, %v537_v48  ;;  %v572_v55 = vmul.f32 %v542_v49, %v410_v43  ;;  %v1738_v56 = vmul.f32 %v542_v49, %v1575_v33  ;;  %v1741_v57 = vmul.f32 %v542_v49, %v1579_v35 }
 0x190   :  { %v545_v61 = vmul.f32 %v1573_v32, %v542_v49  ;;  %v546_v63 = vmul.f32 %v1577_v34, %v542_v49  ;;  %v547_v0 = vmul.f32 %v542_v49, %v1595_v46  ;;  %v548_v1 = vmul.f32 %v542_v49, %v1602_v51 }
 0x191   :  { %v579_v4 = vrot.slane %v538_v53, %v1731_v40  ;;  %v549_v5 = vmul.f32 %v1592_v44, %v542_v49  ;;  %v550_v43 = vmul.f32 %v1600_v50, %v542_v49  ;;  %v551_v33 = vmul.f32 %v542_v49, %v1615_v62 }
 0x192   :  { %v552_v6 = vmul.f32 %v542_v49, %v1622_v3  ;;  %v553_v35 = vmul.f32 %v1612_v60, %v542_v49  ;;  %v554_v32 = vmul.f32 %v1620_v2, %v542_v49  ;;  %v555_v34 = vmul.f32 %v542_v49, %v1635_v14 }
 0x193   :  { %v1755_v7 = vadd.f32 %v579_v4, %v572_v55  ;;  %v556_v46 = vmul.f32 %v542_v49, %v1642_v19  ;;  %v557_v51 = vmul.f32 %v1632_v12, %v542_v49  ;;  %v558_v44 = vmul.f32 %v1640_v18, %v542_v49 }
 0x194   :  { %v559_v50 = vmul.f32 %v542_v49, %v1655_v30  ;;  %v560_v62 = vmul.f32 %v542_v49, %v1662_v39  ;;  %v561_v3 = vmul.f32 %v1652_v28, %v542_v49  ;;  %v562_v60 = vmul.f32 %v1660_v38, %v542_v49 }
 0x195   :  { %v642_v2 = vmax.f32 %v1755_v7, 0.0  ;;  %v563_v14 = vmul.f32 %v542_v49, %v1675_v54  ;;  %v564_v9 = vmul.f32 %v542_v49, %v1682_v59  ;;  %v565_v19 = vmul.f32 %v1672_v52, %v542_v49 }
 0x196   :  { %v566_v12 = vmul.f32 %v1680_v58, %v542_v49  ;;  %v567_v18 = vmul.f32 %v542_v49, %v1695_v10  ;;  %v568_v30 = vmul.f32 %v542_v49, %v1702_v17  ;;  %v569_v39 = vmul.f32 %v1692_v8, %v542_v49 }
 0x197   :  { %v570_v28 = vmul.f32 %v1700_v16, %v542_v49  ;;  %v571_v38 = vmul.f32 %v542_v49, %v1715_v36  ;;  %v573_v11 = vmul.f32 %v1712_v29, %v542_v49  ;;  %v574_v54 = vmul.f32 %v1720_v42, %v542_v49 }
 0x198   :  { %v583_v13 = vadd.f32 %v579_v4, %v545_v61  ;;  %v584_v59 = vadd.f32 %v579_v4, %v546_v63  ;;  %v585_v15 = vadd.f32 %v579_v4, %v547_v0  ;;  %v586_v52 = vadd.f32 %v579_v4, %v548_v1 }
 0x199   :  { %v587_v20 = vadd.f32 %v579_v4, %v549_v5  ;;  %v588_v58 = vadd.f32 %v579_v4, %v550_v43  ;;  %v589_v21 = vadd.f32 %v579_v4, %v551_v33  ;;  %v590_v10 = vadd.f32 %v579_v4, %v552_v6 }
 0x19a   :  { %v591_v22 = vadd.f32 %v579_v4, %v553_v35  ;;  %v592_v17 = vadd.f32 %v579_v4, %v554_v32  ;;  %v593_v23 = vadd.f32 %v579_v4, %v555_v34  ;;  %v594_v8 = vadd.f32 %v579_v4, %v556_v46 }
 0x19b   :  { %v595_v24 = vadd.f32 %v579_v4, %v557_v51  ;;  %v596_v16 = vadd.f32 %v579_v4, %v558_v44  ;;  %v597_v25 = vadd.f32 %v579_v4, %v559_v50  ;;  %v598_v36 = vadd.f32 %v579_v4, %v560_v62 }
 0x19c   :  { %v599_v26 = vadd.f32 %v579_v4, %v561_v3  ;;  %v600_v29 = vadd.f32 %v579_v4, %v562_v60  ;;  %v601_v27 = vadd.f32 %v579_v4, %v563_v14  ;;  %v602_v42 = vadd.f32 %v579_v4, %v564_v9 }
 0x19d   :  { %v603_v31 = vadd.f32 %v579_v4, %v565_v19  ;;  %v604_v37 = vadd.f32 %v579_v4, %v566_v12  ;;  %v605_v41 = vadd.f32 %v579_v4, %v567_v18  ;;  %v606_v45 = vadd.f32 %v579_v4, %v568_v30 }
 0x19e   :  { %v607_v47 = vadd.f32 %v579_v4, %v569_v39  ;;  %v608_v48 = vadd.f32 %v579_v4, %v570_v28  ;;  %v609_v49 = vadd.f32 %v579_v4, %v571_v38  ;;  %v611_v53 = vadd.f32 %v579_v4, %v573_v11 }
 0x19f   :  { %v612_v55 = vadd.f32 %v579_v4, %v574_v54  ;;  %v581_v61 = vadd.f32 %v579_v4, %v1738_v56  ;;  %v582_v63 = vadd.f32 %v579_v4, %v1741_v57  ;;  %v615_v0 = vmax.f32 %v583_v13, 0.0 }
 0x1a0   :  { %v616_v1 = vmax.f32 %v584_v59, 0.0  ;;  %v617_v5 = vmax.f32 %v585_v15, 0.0  ;;  %v618_v43 = vmax.f32 %v586_v52, 0.0  ;;  %v619_v33 = vmax.f32 %v587_v20, 0.0 }
 0x1a1   :  { %v613_v6 = vmax.f32 %v581_v61, 0.0  ;;  %v614_v35 = vmax.f32 %v582_v63, 0.0  ;;  %v620_v32 = vmax.f32 %v588_v58, 0.0  ;;  %v621_v34 = vmax.f32 %v589_v21, 0.0 }
 0x1a2   :  { %v646_v46 = vpack.c.bf16 %v616_v1, %v615_v0  ;;  %v647_v51 = vpack.c.bf16 %v618_v43, %v617_v5  ;;  %v622_v44 = vmax.f32 %v590_v10, 0.0  ;;  %v623_v50 = vmax.f32 %v591_v22, 0.0 }
 0x1a3   :  { %v645_v62 = vpack.c.bf16 %v614_v35, %v613_v6  ;;  %v648_v3 = vpack.c.bf16 %v620_v32, %v619_v33  ;;  %v624_v60 = vmax.f32 %v592_v17, 0.0  ;;  %v625_v14 = vmax.f32 %v593_v23, 0.0 }
 0x1a4   :  { %v649_v56 = vpack.c.bf16 %v622_v44, %v621_v34  ;;  %v626_v9 = vmax.f32 %v594_v8, 0.0  ;;  %v627_v57 = vmax.f32 %v595_v24, 0.0  ;;  %v628_v4 = vmax.f32 %v596_v16, 0.0 }
 0x1a5   :  { %1303 = vmatprep.mubr.bf16.mxu1 %v645_v62  ;;  %v650_v19 = vpack.c.bf16 %v624_v60, %v623_v50  ;;  %v629_v12 = vmax.f32 %v597_v25, 0.0  ;;  %v630_v18 = vmax.f32 %v598_v36, 0.0  ;;  %v631_v30 = vmax.f32 %v599_v26, 0.0 }
 0x1a6   :  { %1304 = vmatmul.mubr.bf16.vlgmr.msra.gmra.mrb[0].mxu1 %v646_v46  ;;  %v651_v39 = vpack.c.bf16 %v626_v9, %v625_v14  ;;  %v652_v28 = vpack.c.bf16 %v628_v4, %v627_v57  ;;  %v632_v38 = vmax.f32 %v600_v29, 0.0  ;;  %v633_v11 = vmax.f32 %v601_v27, 0.0 }
 0x1a7   :  { %1307 = vmatprep.mubr.bf16.mxu1 %v647_v51  ;;  %v653_v54 = vpack.c.bf16 %v630_v18, %v629_v12  ;;  %v634_v13 = vmax.f32 %v602_v42, 0.0  ;;  %v635_v59 = vmax.f32 %v603_v31, 0.0  ;;  %v636_v15 = vmax.f32 %v604_v37, 0.0 }
 0x1a8   :  { %v654_v52 = vpack.c.bf16 %v632_v38, %v631_v30  ;;  %v637_v20 = vmax.f32 %v605_v41, 0.0  ;;  %v638_v58 = vmax.f32 %v606_v45, 0.0  ;;  %v639_v21 = vmax.f32 %v607_v47, 0.0 }
 0x1a9   :  { %v655_v10 = vpack.c.bf16 %v634_v13, %v633_v11  ;;  %v656_v22 = vpack.c.bf16 %v636_v15, %v635_v59  ;;  %v640_v17 = vmax.f32 %v608_v48, 0.0  ;;  %v641_v23 = vmax.f32 %v609_v49, 0.0 }
 0x1aa   :  { %v657_v8 = vpack.c.bf16 %v638_v58, %v637_v20  ;;  %v643_v24 = vmax.f32 %v611_v53, 0.0  ;;  %v644_v16 = vmax.f32 %v612_v55, 0.0 }
 0x1ab   :  { %v658_v25 = vpack.c.bf16 %v640_v17, %v639_v21  ;;  %v659_v36 = vpack.c.bf16 %v642_v2, %v641_v23 }
 0x1ac   :  { %v660_v26 = vpack.c.bf16 %v644_v16, %v643_v24 }
 0x1ae   :  { %1308 = vmatmul.mubr.bf16.gmra.mrb[4].mxu1 %v648_v3 }
 0x1af   :  { %1311 = vmatprep.mubr.bf16.mxu1 %v649_v56 }
 0x1b6   :  { %1312 = vmatmul.mubr.bf16.gmra.mrb[8].mxu1 %v650_v19 }
 0x1b7   :  { %1315 = vmatprep.mubr.bf16.mxu1 %v651_v39 }
 0x1be   :  { %1316 = vmatmul.mubr.bf16.gmra.mrb[12].mxu1 %v652_v28 }
 0x1bf   :  { %1319 = vmatprep.mubr.bf16.mxu1 %v653_v54 }
 0x1c6   :  { %1320 = vmatmul.mubr.bf16.gmra.mrb[16].mxu1 %v654_v52 }
 0x1c7   :  { %1323 = vmatprep.mubr.bf16.mxu1 %v655_v10 }
 0x1ce   :  { %1324 = vmatmul.mubr.bf16.gmra.mrb[20].mxu1 %v656_v22 }
 0x1cf   :  { %1327 = vmatprep.mubr.bf16.mxu1 %v657_v8 }
 0x1d6   :  { %1328 = vmatmul.mubr.bf16.gmra.mrb[24].mxu1 %v658_v25 }
 0x1d7   :  { %1331 = vmatprep.mubr.bf16.mxu1 %v659_v36 }
 0x1de   :  { %1332 = vmatmul.mubr.bf16.gmra.mrb[28].mxu1 %v660_v26 }
 0x279   :  { %v1780_v29 = vpop.f32.mrb[0].mxu1 }
 0x27a   :  { %v1782_v27 = vpop.f32.mrb[1].mxu1  ;;  %v925_v41 = vmul.f32 %v1780_v29, %v1780_v29 }
 0x27b   :  { %v1784_v7 = vpop.f32.mrb[2].mxu1  ;;  %v923_v42 = vmul.f32 %v1782_v27, %v1782_v27 }
 0x27c   :  { %v1786_v2 = vpop.f32.mrb[3].mxu1  ;;  %v926_v48 = vmul.f32 %v1784_v7, %v1784_v7 }
 0x27d   :  { %v886_v31 = vadd.f32 %v1786_v2, %v1782_v27  ;;  %v924_v37 = vmul.f32 %v1786_v2, %v1786_v2 }
 0x27f   :  { %v887_v45 = vadd.f32 %v1780_v29, %v886_v31  ;;  %v955_v47 = vadd.f32 %v924_v37, %v923_v42 }
 0x281   :  { %v956_v49 = vadd.f32 %v955_v47, %v925_v41  ;;  %v1799_v53 = vpop.f32.mrb[4].mxu1  ;;  %v888_v55 = vadd.f32 %v1784_v7, %v887_v45 }
 0x282   :  { %v1802_v61 = vpop.f32.mrb[5].mxu1  ;;  %v929_v32 = vmul.f32 %v1799_v53, %v1799_v53 }
 0x283   :  { %v889_v63 = vadd.f32 %v888_v55, %v1802_v61  ;;  %v927_v0 = vmul.f32 %v1802_v61, %v1802_v61  ;;  %v957_v1 = vadd.f32 %v956_v49, %v926_v48  ;;  %v1807_v5 = vpop.f32.mrb[6].mxu1 }
 0x284   :  { %v1809_v43 = vpop.f32.mrb[7].mxu1  ;;  %v930_v51 = vmul.f32 %v1807_v5, %v1807_v5 }
 0x285   :  { %v958_v33 = vadd.f32 %v957_v1, %v927_v0  ;;  %v890_v6 = vadd.f32 %v889_v63, %v1809_v43  ;;  %v928_v35 = vmul.f32 %v1809_v43, %v1809_v43 }
 0x287   :  { %v891_v34 = vadd.f32 %v1799_v53, %v890_v6  ;;  %v959_v46 = vadd.f32 %v958_v33, %v928_v35 }
 0x289   :  { %v960_v44 = vadd.f32 %v959_v46, %v929_v32  ;;  %v1819_v50 = vpop.f32.mrb[8].mxu1  ;;  %v892_v62 = vadd.f32 %v1807_v5, %v891_v34 }
 0x28a   :  { %v1822_v3 = vpop.f32.mrb[9].mxu1  ;;  %v933_v18 = vmul.f32 %v1819_v50, %v1819_v50 }
 0x28b   :  { %v893_v60 = vadd.f32 %v892_v62, %v1822_v3  ;;  %v931_v14 = vmul.f32 %v1822_v3, %v1822_v3  ;;  %v961_v56 = vadd.f32 %v960_v44, %v930_v51  ;;  %v1827_v9 = vpop.f32.mrb[10].mxu1 }
 0x28c   :  { %v1829_v57 = vpop.f32.mrb[11].mxu1  ;;  %v934_v28 = vmul.f32 %v1827_v9, %v1827_v9 }
 0x28d   :  { %v962_v4 = vadd.f32 %v961_v56, %v931_v14  ;;  %v894_v19 = vadd.f32 %v893_v60, %v1829_v57  ;;  %v932_v12 = vmul.f32 %v1829_v57, %v1829_v57 }
 0x28f   :  { %v895_v30 = vadd.f32 %v1819_v50, %v894_v19  ;;  %v963_v39 = vadd.f32 %v962_v4, %v932_v12 }
 0x291   :  { %v964_v38 = vadd.f32 %v963_v39, %v933_v18  ;;  %v1839_v11 = vpop.f32.mrb[12].mxu1  ;;  %v896_v54 = vadd.f32 %v1827_v9, %v895_v30 }
 0x292   :  { %v1842_v13 = vpop.f32.mrb[13].mxu1  ;;  %v937_v17 = vmul.f32 %v1839_v11, %v1839_v11 }
 0x293   :  { %v897_v59 = vadd.f32 %v896_v54, %v1842_v13  ;;  %v935_v15 = vmul.f32 %v1842_v13, %v1842_v13  ;;  %v965_v52 = vadd.f32 %v964_v38, %v934_v28  ;;  %v1847_v20 = vpop.f32.mrb[14].mxu1 }
 0x294   :  { %v1849_v58 = vpop.f32.mrb[15].mxu1  ;;  %v938_v24 = vmul.f32 %v1847_v20, %v1847_v20 }
 0x295   :  { %v966_v21 = vadd.f32 %v965_v52, %v935_v15  ;;  %v898_v10 = vadd.f32 %v897_v59, %v1849_v58  ;;  %v936_v22 = vmul.f32 %v1849_v58, %v1849_v58 }
 0x297   :  { %v899_v23 = vadd.f32 %v1839_v11, %v898_v10  ;;  %v967_v8 = vadd.f32 %v966_v21, %v936_v22 }
 0x299   :  { %v968_v16 = vadd.f32 %v967_v8, %v937_v17  ;;  %v1859_v25 = vpop.f32.mrb[16].mxu1  ;;  %v900_v36 = vadd.f32 %v1847_v20, %v899_v23 }
 0x29a   :  { %v1862_v26 = vpop.f32.mrb[17].mxu1  ;;  %v941_v55 = vmul.f32 %v1859_v25, %v1859_v25 }
 0x29b   :  { %v901_v42 = vadd.f32 %v900_v36, %v1862_v26  ;;  %v939_v31 = vmul.f32 %v1862_v26, %v1862_v26  ;;  %v969_v37 = vadd.f32 %v968_v16, %v938_v24  ;;  %v1867_v41 = vpop.f32.mrb[18].mxu1 }
 0x29c   :  { %v1869_v45 = vpop.f32.mrb[19].mxu1  ;;  %v942_v1 = vmul.f32 %v1867_v41, %v1867_v41 }
 0x29d   :  { %v970_v47 = vadd.f32 %v969_v37, %v939_v31  ;;  %v902_v48 = vadd.f32 %v901_v42, %v1869_v45  ;;  %v940_v49 = vmul.f32 %v1869_v45, %v1869_v45 }
 0x29f   :  { %v903_v63 = vadd.f32 %v1859_v25, %v902_v48  ;;  %v971_v0 = vadd.f32 %v970_v47, %v940_v49 }
 0x2a1   :  { %v972_v33 = vadd.f32 %v971_v0, %v941_v55  ;;  %v1879_v6 = vpop.f32.mrb[20].mxu1  ;;  %v904_v35 = vadd.f32 %v1867_v41, %v903_v63 }
 0x2a2   :  { %v1882_v32 = vpop.f32.mrb[21].mxu1  ;;  %v945_v4 = vmul.f32 %v1879_v6, %v1879_v6 }
 0x2a3   :  { %v905_v34 = vadd.f32 %v904_v35, %v1882_v32  ;;  %v943_v46 = vmul.f32 %v1882_v32, %v1882_v32  ;;  %v973_v51 = vadd.f32 %v972_v33, %v942_v1  ;;  %v1887_v44 = vpop.f32.mrb[22].mxu1 }
 0x2a4   :  { %v1889_v62 = vpop.f32.mrb[23].mxu1  ;;  %v946_v18 = vmul.f32 %v1887_v44, %v1887_v44 }
 0x2a5   :  { %v974_v60 = vadd.f32 %v973_v51, %v943_v46  ;;  %v906_v14 = vadd.f32 %v905_v34, %v1889_v62  ;;  %v944_v56 = vmul.f32 %v1889_v62, %v1889_v62 }
 0x2a7   :  { %v907_v19 = vadd.f32 %v1879_v6, %v906_v14  ;;  %v975_v12 = vadd.f32 %v974_v60, %v944_v56 }
 0x2a9   :  { %v976_v30 = vadd.f32 %v975_v12, %v945_v4  ;;  %v1899_v39 = vpop.f32.mrb[24].mxu1  ;;  %v908_v28 = vadd.f32 %v1887_v44, %v907_v19 }
 0x2aa   :  { %v1902_v38 = vpop.f32.mrb[25].mxu1  ;;  %v949_v23 = vmul.f32 %v1899_v39, %v1899_v39 }
 0x2ab   :  { %v909_v54 = vadd.f32 %v908_v28, %v1902_v38  ;;  %v947_v59 = vmul.f32 %v1902_v38, %v1902_v38  ;;  %v977_v15 = vadd.f32 %v976_v30, %v946_v18  ;;  %v1907_v52 = vpop.f32.mrb[26].mxu1 }
 0x2ac   :  { %v1909_v21 = vpop.f32.mrb[27].mxu1  ;;  %v950_v16 = vmul.f32 %v1907_v52, %v1907_v52 }
 0x2ad   :  { %v978_v10 = vadd.f32 %v977_v15, %v947_v59  ;;  %v910_v22 = vadd.f32 %v909_v54, %v1909_v21  ;;  %v948_v17 = vmul.f32 %v1909_v21, %v1909_v21 }
 0x2af   :  { %v911_v8 = vadd.f32 %v1899_v39, %v910_v22  ;;  %v979_v24 = vadd.f32 %v978_v10, %v948_v17 }
 0x2b1   :  { %v980_v36 = vadd.f32 %v979_v24, %v949_v23  ;;  %v1919_v42 = vpop.f32.mrb[28].mxu1  ;;  %v912_v31 = vadd.f32 %v1907_v52, %v911_v8 }
 0x2b2   :  { %v1922_v37 = vpop.f32.mrb[29].mxu1  ;;  %v953_v35 = vmul.f32 %v1919_v42, %v1919_v42 }
 0x2b3   :  { %v913_v47 = vadd.f32 %v912_v31, %v1922_v37  ;;  %v951_v48 = vmul.f32 %v1922_v37, %v1922_v37  ;;  %v981_v49 = vadd.f32 %v980_v36, %v950_v16  ;;  %v1927_v55 = vpop.f32.mrb[30].mxu1  ;;  %v998_v31 = vld [vmem:[%s2028_s5] sm:$0x1]  ;;  %s1478_s5 = smov [#allocation8]  }
 0x2b4   :  { %v874_v63 = vpop.f32.mrb[31].mxu1  ;;  %v954_v51 = vmul.f32 %v1927_v55, %v1927_v55 }
 0x2b5   :  { %v982_v0 = vadd.f32 %v981_v49, %v951_v48  ;;  %v914_v1 = vadd.f32 %v913_v47, %v874_v63  ;;  %v952_v33 = vmul.f32 %v874_v63, %v874_v63  ;;  %v1000_v49 = vld [vmem:[%s2029_s6] sm:$0x1]  ;;  %s1146_s6 = sshll.u32 %s1478_s5, 4  ;;  %s2002_s6 = int_to_ptr.vmem [resolvable:$true] %s1146_s6 }
 0x2b6   :  { %s1445_s19 = scalar_lea.vmem %s2002_s6, 4096  ;;  %p1450_p11 = scmp.lt.s32.totalorder %s2002_s6, %s2002_s6 }
 0x2b7   :  { %v915_v34 = vadd.f32 %v1919_v42, %v914_v1  ;;  %v983_v46 = vadd.f32 %v982_v0, %v952_v33  ;;  %p1446_p10 = scmp.ne.s32.totalorder %s2002_s6, %s1445_s19  ;;  %p1451_p12 = scmp.lt.s32.totalorder %s1445_s19, %s1445_s19 }
 0x2b9   :  { %v916_v60 = vadd.f32 %v1927_v55, %v915_v34  ;;  %v984_v14 = vadd.f32 %v983_v46, %v953_v35  ;;  %p1452_p13 = por %p1451_p12, %p1450_p11 }
 0x2bb   :  { %v917_v56 = vrot.slane %v916_v60, 4  ;;  %v985_v4 = vadd.f32 %v984_v14, %v954_v51  ;;  %p1453_p0 = pnand %p1452_p13, %p1446_p10 }
 0x2bd   :  { %v918_v19 = vadd.f32 %v917_v56, %v916_v60  ;;  %v986_v12 = vrot.slane %v985_v4, 4 }
 0x2bf   :  { %v919_v18 = vrot.slane %v918_v19, 2  ;;  %v987_v30 = vadd.f32 %v986_v12, %v985_v4 }
 0x2c1   :  { %v920_v28 = vadd.f32 %v919_v18, %v918_v19  ;;  %v988_v54 = vrot.slane %v987_v30, 2 }
 0x2c3   :  { %v921_v59 = vrot.slane %v920_v28, 1  ;;  %v989_v15 = vadd.f32 %v988_v54, %v987_v30 }
 0x2c5   :  { %v922_v10 = vadd.f32 %v921_v59, %v920_v28  ;;  %v990_v22 = vrot.slane %v989_v15, 1 }
 0x2c7   :  { %v991_v17 = vadd.f32 %v990_v22, %v989_v15  ;;  %v992_v23 = vmul.f32 0.00390625, %v922_v10 }
 0x2c9   :  { %v993_v8 = vmul.f32 0.00390625, %v991_v17  ;;  %v994_v24 = vmul.f32 %v992_v23, %v992_v23 }
 0x2cb   :  { %v995_v16 = vsub.f32 %v993_v8, %v994_v24 }
 0x2cd   :  { %v996_v36 = vadd.f32 1e-05, %v995_v16 }
 0x2cf   :  { %1377 = vrsqrt.f32 %v996_v36 }
 0x2d9   :  { %v1378_v47 = vpop.eup %1377 }
 0x2da   :  { %v999_v48 = vmul.f32 %v1378_v47, %v998_v31 }
 0x2dc   :  { %v1001_v0 = vmul.f32 %v999_v48, %v992_v23  ;;  %v1006_v1 = vrot.slane %v999_v48, %v1731_v40 }
 0x2de   :  { %v1002_v33 = vsub.f32 %v1000_v49, %v1001_v0  ;;  %v1036_v35 = vmul.f32 %v1006_v1, %v874_v63  ;;  %v1007_v34 = vmul.f32 %v1006_v1, %v1782_v27  ;;  %v1008_v46 = vmul.f32 %v1006_v1, %v1786_v2 }
 0x2df   :  { %v1009_v51 = vmul.f32 %v1780_v29, %v1006_v1  ;;  %v1010_v60 = vmul.f32 %v1784_v7, %v1006_v1  ;;  %v1011_v14 = vmul.f32 %v1006_v1, %v1802_v61  ;;  %v1012_v56 = vmul.f32 %v1006_v1, %v1809_v43 }
 0x2e0   :  { %v1043_v4 = vrot.slane %v1002_v33, %v1731_v40  ;;  %v1013_v19 = vmul.f32 %v1799_v53, %v1006_v1  ;;  %v1014_v12 = vmul.f32 %v1807_v5, %v1006_v1  ;;  %v1015_v63 = vmul.f32 %v1006_v1, %v1822_v3 }
 0x2e1   :  { %v1016_v27 = vmul.f32 %v1006_v1, %v1829_v57  ;;  %v1017_v2 = vmul.f32 %v1819_v50, %v1006_v1  ;;  %v1018_v29 = vmul.f32 %v1827_v9, %v1006_v1  ;;  %v1019_v7 = vmul.f32 %v1006_v1, %v1842_v13 }
 0x2e2   :  { %v1074_v18 = vadd.f32 %v1043_v4, %v1036_v35  ;;  %v1020_v61 = vmul.f32 %v1006_v1, %v1849_v58  ;;  %v1021_v43 = vmul.f32 %v1839_v11, %v1006_v1  ;;  %v1022_v40 = vmul.f32 %v1847_v20, %v1006_v1 }
 0x2e3   :  { %v1023_v53 = vmul.f32 %v1006_v1, %v1862_v26  ;;  %v1024_v5 = vmul.f32 %v1006_v1, %v1869_v45  ;;  %v1025_v3 = vmul.f32 %v1859_v25, %v1006_v1  ;;  %v1026_v57 = vmul.f32 %v1867_v41, %v1006_v1 }
 0x2e4   :  { %v1106_v50 = vmax.f32 %v1074_v18, 0.0  ;;  %v1027_v9 = vmul.f32 %v1006_v1, %v1882_v32  ;;  %v1028_v13 = vmul.f32 %v1006_v1, %v1889_v62  ;;  %v1029_v30 = vmul.f32 %v1879_v6, %v1006_v1 }
 0x2e5   :  { %v1030_v58 = vmul.f32 %v1887_v44, %v1006_v1  ;;  %v1031_v11 = vmul.f32 %v1006_v1, %v1902_v38  ;;  %v1032_v20 = vmul.f32 %v1006_v1, %v1909_v21  ;;  %v1033_v26 = vmul.f32 %v1899_v39, %v1006_v1 }
 0x2e6   :  { %1138 = vst [vmem:[#allocation8 + $0xe8] sm:$0xff] %v1106_v50  ;;  %v1034_v25 = vmul.f32 %v1907_v52, %v1006_v1  ;;  %v1035_v41 = vmul.f32 %v1006_v1, %v1922_v37  ;;  %v1037_v45 = vmul.f32 %v1919_v42, %v1006_v1  ;;  %v1038_v32 = vmul.f32 %v1927_v55, %v1006_v1 }
 0x2e7   :  { %v1045_v62 = vadd.f32 %v1043_v4, %v1007_v34  ;;  %v1046_v28 = vadd.f32 %v1043_v4, %v1008_v46  ;;  %v1047_v6 = vadd.f32 %v1043_v4, %v1009_v51  ;;  %v1048_v54 = vadd.f32 %v1043_v4, %v1010_v60 }
 0x2e8   :  { %v1049_v44 = vadd.f32 %v1043_v4, %v1011_v14  ;;  %v1050_v59 = vadd.f32 %v1043_v4, %v1012_v56  ;;  %v1051_v38 = vadd.f32 %v1043_v4, %v1013_v19  ;;  %v1052_v15 = vadd.f32 %v1043_v4, %v1014_v12 }
 0x2e9   :  { %v1053_v21 = vadd.f32 %v1043_v4, %v1015_v63  ;;  %v1054_v10 = vadd.f32 %v1043_v4, %v1016_v27  ;;  %v1055_v39 = vadd.f32 %v1043_v4, %v1017_v2  ;;  %v1056_v22 = vadd.f32 %v1043_v4, %v1018_v29 }
 0x2ea   :  { %v1057_v17 = vadd.f32 %v1043_v4, %v1019_v7  ;;  %v1058_v52 = vadd.f32 %v1043_v4, %v1020_v61  ;;  %v1059_v23 = vadd.f32 %v1043_v4, %v1021_v43  ;;  %v1060_v37 = vadd.f32 %v1043_v4, %v1022_v40 }
 0x2eb   :  { %v1061_v8 = vadd.f32 %v1043_v4, %v1023_v53  ;;  %v1062_v42 = vadd.f32 %v1043_v4, %v1024_v5  ;;  %v1063_v24 = vadd.f32 %v1043_v4, %v1025_v3  ;;  %v1064_v55 = vadd.f32 %v1043_v4, %v1026_v57 }
 0x2ec   :  { %v1065_v16 = vadd.f32 %v1043_v4, %v1027_v9  ;;  %v1974_v36 = vadd.f32 %v1043_v4, %v1028_v13  ;;  %v1976_v31 = vadd.f32 %v1043_v4, %v1029_v30  ;;  %v1978_v47 = vadd.f32 %v1043_v4, %v1030_v58 }
 0x2ed   :  { %v1980_v48 = vadd.f32 %v1043_v4, %v1031_v11  ;;  %v1982_v49 = vadd.f32 %v1043_v4, %v1032_v20  ;;  %v1984_v0 = vadd.f32 %v1043_v4, %v1033_v26  ;;  %v1986_v1 = vadd.f32 %v1043_v4, %v1034_v25 }
 0x2ee   :  { %v1988_v33 = vadd.f32 %v1043_v4, %v1035_v41  ;;  %v1990_v35 = vadd.f32 %v1043_v4, %v1037_v45  ;;  %v1992_v34 = vadd.f32 %v1043_v4, %v1038_v32  ;;  %v1077_v46 = vmax.f32 %v1045_v62, 0.0 }
 0x2ef   :  { %v1078_v51 = vmax.f32 %v1046_v28, 0.0  ;;  %v1079_v60 = vmax.f32 %v1047_v6, 0.0  ;;  %v1080_v14 = vmax.f32 %v1048_v54, 0.0  ;;  %v1081_v56 = vmax.f32 %v1049_v44, 0.0 }
 0x2f0   :  { %v1082_v19 = vmax.f32 %v1050_v59, 0.0  ;;  %v1083_v12 = vmax.f32 %v1051_v38, 0.0  ;;  %v1084_v63 = vmax.f32 %v1052_v15, 0.0  ;;  %v1085_v27 = vmax.f32 %v1053_v21, 0.0  ;;  %1109 = vst [vmem:[#allocation8] sm:$0xff] %v1077_v46 }
 0x2f1   :  { %v1086_v2 = vmax.f32 %v1054_v10, 0.0  ;;  %v1087_v29 = vmax.f32 %v1055_v39, 0.0  ;;  %v1088_v7 = vmax.f32 %v1056_v22, 0.0  ;;  %v1089_v18 = vmax.f32 %v1057_v17, 0.0  ;;  %1110 = vst [vmem:[#allocation8 + $0x8] sm:$0xff] %v1078_v51  ;;  %1111 = vst [vmem:[#allocation8 + $0x10] sm:$0xff] %v1079_v60 }
 0x2f2   :  { %1112 = vst [vmem:[#allocation8 + $0x18] sm:$0xff] %v1080_v14  ;;  %1113 = vst [vmem:[#allocation8 + $0x20] sm:$0xff] %v1081_v56  ;;  %v1090_v4 = vmax.f32 %v1058_v52, 0.0  ;;  %v1091_v61 = vmax.f32 %v1059_v23, 0.0  ;;  %v1092_v43 = vmax.f32 %v1060_v37, 0.0  ;;  %v1093_v40 = vmax.f32 %v1061_v8, 0.0 }
 0x2f3   :  { %1114 = vst [vmem:[#allocation8 + $0x28] sm:$0xff] %v1082_v19  ;;  %1115 = vst [vmem:[#allocation8 + $0x30] sm:$0xff] %v1083_v12  ;;  %v1094_v53 = vmax.f32 %v1062_v42, 0.0  ;;  %v1095_v5 = vmax.f32 %v1063_v24, 0.0  ;;  %v1096_v3 = vmax.f32 %v1064_v55, 0.0  ;;  %v1097_v57 = vmax.f32 %v1065_v16, 0.0 }
 0x2f4   :  { %1116 = vst [vmem:[#allocation8 + $0x38] sm:$0xff] %v1084_v63  ;;  %1117 = vst [vmem:[#allocation8 + $0x40] sm:$0xff] %v1085_v27  ;;  %v1098_v50 = vmax.f32 %v1974_v36, 0.0  ;;  %v1099_v9 = vmax.f32 %v1976_v31, 0.0  ;;  %v1100_v13 = vmax.f32 %v1978_v47, 0.0  ;;  %v1101_v30 = vmax.f32 %v1980_v48, 0.0 }
 0x2f5   :  { %1118 = vst [vmem:[#allocation8 + $0x48] sm:$0xff] %v1086_v2  ;;  %1119 = vst [vmem:[#allocation8 + $0x50] sm:$0xff] %v1087_v29  ;;  %v1102_v58 = vmax.f32 %v1982_v49, 0.0  ;;  %v1103_v11 = vmax.f32 %v1984_v0, 0.0  ;;  %v1104_v20 = vmax.f32 %v1986_v1, 0.0  ;;  %v1105_v26 = vmax.f32 %v1988_v33, 0.0 }
 0x2f6   :  { %1120 = vst [vmem:[#allocation8 + $0x58] sm:$0xff] %v1088_v7  ;;  %1121 = vst [vmem:[#allocation8 + $0x60] sm:$0xff] %v1089_v18  ;;  %v1107_v25 = vmax.f32 %v1990_v35, 0.0  ;;  %v1108_v41 = vmax.f32 %v1992_v34, 0.0 }
 0x2f7   :  { %1122 = vst [vmem:[#allocation8 + $0x68] sm:$0xff] %v1090_v4  ;;  %1123 = vst [vmem:[#allocation8 + $0x70] sm:$0xff] %v1091_v61 }
 0x2f8   :  { %1124 = vst [vmem:[#allocation8 + $0x78] sm:$0xff] %v1092_v43  ;;  %1125 = vst [vmem:[#allocation8 + $0x80] sm:$0xff] %v1093_v40 }
 0x2f9   :  { %1126 = vst [vmem:[#allocation8 + $0x88] sm:$0xff] %v1094_v53  ;;  %1127 = vst [vmem:[#allocation8 + $0x90] sm:$0xff] %v1095_v5 }
 0x2fa   :  { %1128 = vst [vmem:[#allocation8 + $0x98] sm:$0xff] %v1096_v3  ;;  %1129 = vst [vmem:[#allocation8 + $0xa0] sm:$0xff] %v1097_v57 }
 0x2fb   :  { %1130 = vst [vmem:[#allocation8 + $0xa8] sm:$0xff] %v1098_v50  ;;  %1131 = vst [vmem:[#allocation8 + $0xb0] sm:$0xff] %v1099_v9 }
 0x2fc   :  { %1132 = vst [vmem:[#allocation8 + $0xb8] sm:$0xff] %v1100_v13  ;;  %1133 = vst [vmem:[#allocation8 + $0xc0] sm:$0xff] %v1101_v30 }
 0x2fd   :  { %1134 = vst [vmem:[#allocation8 + $0xc8] sm:$0xff] %v1102_v58  ;;  %1135 = vst [vmem:[#allocation8 + $0xd0] sm:$0xff] %v1103_v11 }
 0x2fe   :  { %1136 = vst [vmem:[#allocation8 + $0xd8] sm:$0xff] %v1104_v20  ;;  %1137 = vst [vmem:[#allocation8 + $0xe0] sm:$0xff] %v1105_v26 }
 0x2ff   :  { %1139 = vst [vmem:[#allocation8 + $0xf0] sm:$0xff] %v1107_v25  ;;  %1140 = vst [vmem:[#allocation8 + $0xf8] sm:$0xff] %v1108_v41 }
 0x300   :  { %1456 = shalt.err (!%p1453_p0)
}
 0x301   :  { %s1457_s22 = scalar_lea.hbm %s2030_s7, 4096 }
 0x302   :  { %p1458_p1 = scmp.ne.s32.totalorder %s2030_s7, %s1457_s22  ;;  %p1461_p2 = scmp.lt.u32.totalorder %s1457_s22, %s2030_s7 }
 0x304   :  { %p1463_p3 = pnand %p1461_p2, %p1458_p1 }
 0x306   :  { %1466 = shalt.err (!%p1463_p3)
}
 0x307   :  { %s1479_s26 = smov 128   ;;  %s1480_s28 = smov 8  }
 0x308   :  { %1152 = dma.vmem_to_hbm [thread:$0]  %s2002_s6, 4096, %s2030_s7, [#allocation4], %s1479_s26, %s1479_s26, %s1480_s28  }
 0x309   :  { %1471 = dma.done.wait [#allocation4], 4096  }
 0x30a   :  { %1472 = vsyncadd [#allocation4], 4294963200 }
 0x30b   :  { %1156 = vsyncpa [#allocation3], 1 }
 0x30c   :  { %1157 = vsyncpa [#allocation6], 1 }
 0x30d   :  { %1158 = vsyncpa [#allocation4], 1 }

</bundles_post_ra>
